<compile_context>
chip_gen: v6e
topology: v6e:2x2x1
jax: 0.10.0
libtpu: 0.0.40
codegen_flags: <defaults>
</compile_context>

<pallas_src>
import functools

import jax
import jax.numpy as jnp
from jax.experimental import pallas as pl
from jax.experimental.pallas import tpu as pltpu

EPS = 1e-5
LANE = 128


def _round_up(n, m):
    return ((n + m - 1) // m) * m


def expert_kernel(x_ref, w1_ref, b1_ref, w2_ref, b2_ref, o_ref, *, hidden_size):
    # x_ref:  (TB, D_in)   w1_ref: (D_in, Hp)  b1_ref: (1, Hp)
    # w2_ref: (Hp, Op)     b2_ref: (1, Op)     o_ref:  (TB, Op)
    x = x_ref[...]

    # fc1 on the MXU, f32 accumulation regardless of input dtype.
    h = jnp.dot(x, w1_ref[...], preferred_element_type=jnp.float32) + b1_ref[...]

    # InstanceNorm1d on 2D input == per-row normalization over the real hidden
    # columns (biased variance, eps=1e-5, no affine).  Padded lanes of h are
    # exactly zero (zero-padded W1 columns / b1 entries), so plain lane sums
    # equal sums over the first `hidden_size` columns -> no mask needed.
    # Single fused pass: var = E[h^2] - mean^2.
    inv_h = jnp.float32(1.0 / hidden_size)
    s1 = jnp.sum(h, axis=-1, keepdims=True)
    s2 = jnp.sum(h * h, axis=-1, keepdims=True)
    mean = s1 * inv_h
    var = s2 * inv_h - mean * mean
    normed = (h - mean) * jax.lax.rsqrt(var + EPS)

    # ReLU (VPU, f32).  Padded lanes carry -mean*rsqrt garbage here, but W2's
    # padded rows are zero, so they contribute nothing to fc2.
    r = jnp.maximum(normed, 0.0)

    # fc2 on the MXU, lane-dense (Hp x Op) thanks to padding; dense output store.
    out = jnp.dot(r.astype(w2_ref.dtype), w2_ref[...],
                  preferred_element_type=jnp.float32) + b2_ref[...]
    o_ref[...] = out.astype(o_ref.dtype)


def expert_forward(x, w1, b1, w2, b2, *, batch_tile=None,
                   compute_dtype=jnp.float32):
    """x:(B,D_in), w1:(D_in,H)=fc1.weight.T, b1:(1,H), w2:(H,O)=fc2.weight.T, b2:(1,O)."""
    B, D_in = x.shape
    H = w1.shape[1]
    O = w2.shape[1]

    # Lane-pad hidden / output feature dims to 128 (done once; would be
    # precomputed weight prep in a real deployment).
    Hp = _round_up(H, LANE)
    Op = _round_up(O, LANE)
    w1p = jnp.pad(w1, ((0, 0), (0, Hp - H))).astype(compute_dtype)
    b1p = jnp.pad(b1, ((0, 0), (0, Hp - H))).astype(jnp.float32)
    w2p = jnp.pad(w2, ((0, Hp - H), (0, Op - O))).astype(jnp.float32)
    b2p = jnp.pad(b2, ((0, 0), (0, Op - O))).astype(jnp.float32)

    # Collapse the grid: the whole problem fits in VMEM at these sizes.  For
    # larger batches cap the tile at 512 rows (multiple of 256 -> full MXU,
    # multiple parallel steps -> both v7x TensorCores).
    if batch_tile is None:
        batch_tile = min(_round_up(B, 8), 512)
    Bp = _round_up(B, batch_tile)
    xp = x if Bp == B else jnp.pad(x, ((0, Bp - B), (0, 0)))
    xp = xp.astype(compute_dtype)

    grid = (Bp // batch_tile,)
    out = pl.pallas_call(
        functools.partial(expert_kernel, hidden_size=H),
        out_shape=jax.ShapeDtypeStruct((Bp, Op), jnp.float32),
        grid_spec=pltpu.PrefetchScalarGridSpec(
            num_scalar_prefetch=0,
            grid=grid,
            in_specs=[
                pl.BlockSpec((batch_tile, D_in), lambda i: (i, 0)),  # x tile
                pl.BlockSpec((D_in, Hp), lambda i: (0, 0)),          # W1 (full, lane-padded)
                pl.BlockSpec((1, Hp), lambda i: (0, 0)),             # b1
                pl.BlockSpec((Hp, Op), lambda i: (0, 0)),            # W2 (full, lane-padded)
                pl.BlockSpec((1, Op), lambda i: (0, 0)),             # b2
            ],
            out_specs=pl.BlockSpec((batch_tile, Op), lambda i: (i, 0)),
        ),
        compiler_params=pltpu.CompilerParams(
            dimension_semantics=("parallel",),
        ),
    )(xp, w1p, b1p, w2p, b2p)

    # Strip batch / lane padding outside the kernel (kernel store stays dense).
    return out[:B, :O]


def init_params(key, input_size, hidden_size, output_size):
    """Deterministic synthetic init mirroring the module's shapes.
    fc weights: xavier_uniform; biases: uniform(-1/sqrt(fan_in), 1/sqrt(fan_in))."""
    k1, k2, k3, k4 = jax.random.split(key, 4)

    def xavier(key, fan_in, fan_out):
        limit = jnp.sqrt(6.0 / (fan_in + fan_out))
        return jax.random.uniform(
            key, (fan_in, fan_out), jnp.float32, minval=-limit, maxval=limit)

    w1 = xavier(k1, input_size, hidden_size)     # (D_in, H) == fc1.weight.T
    w2 = xavier(k2, hidden_size, output_size)    # (H, O)   == fc2.weight.T
    b1 = jax.random.uniform(
        k3, (1, hidden_size), jnp.float32,
        minval=-1.0 / jnp.sqrt(input_size), maxval=1.0 / jnp.sqrt(input_size))
    b2 = jax.random.uniform(
        k4, (1, output_size), jnp.float32,
        minval=-1.0 / jnp.sqrt(hidden_size), maxval=1.0 / jnp.sqrt(hidden_size))
    return w1, b1, w2, b2


def expert_ref(x, w1, b1, w2, b2):
    """Pure-JAX reference (two-pass norm, unpadded) for correctness checking."""
    h = x @ w1 + b1
    mean = jnp.mean(h, axis=-1, keepdims=True)
    var = jnp.mean((h - mean) ** 2, axis=-1, keepdims=True)
    n = (h - mean) / jnp.sqrt(var + EPS)
    r = jnp.maximum(n, 0.0)
    return r @ w2 + b2


if __name__ == "__main__":
    input_size, hidden_size, output_size = 768, 20, 2
    batch = 16

    key = jax.random.PRNGKey(0)
    kx, kp = jax.random.split(key)
    x = jax.random.normal(kx, (batch, input_size), jnp.float32)
    w1, b1, w2, b2 = init_params(kp, input_size, hidden_size, output_size)

    out = expert_forward(x, w1, b1, w2, b2)   # f32, single grid step at this size
    out = jax.block_until_ready(out)

    ref = expert_ref(x, w1, b1, w2, b2)
    assert out.shape == (batch, output_size)
    assert jnp.allclose(out, ref, atol=1e-4, rtol=1e-4), "mismatch vs reference"

    print("KERNEL_OK")
</pallas_src>

<mosaic_0001>
module attributes {stable_mosaic.version = 11 : i64} {
  func.func @expert_kernel(%arg0: i32, %arg1: memref<16x768xf32, #tpu.memory_space<vmem>>, %arg2: memref<768x128xf32, #tpu.memory_space<vmem>>, %arg3: memref<1x128xf32, #tpu.memory_space<vmem>>, %arg4: memref<128x128xf32, #tpu.memory_space<vmem>>, %arg5: memref<1x128xf32, #tpu.memory_space<vmem>>, %arg6: memref<16x128xf32, #tpu.memory_space<vmem>>) attributes {dimension_semantics = [#tpu.dimension_semantics<parallel>], iteration_bounds = array<i64: 1>, scalar_prefetch = 0 : i64, scratch_operands = 0 : i64, tpu.core_type = #tpu.core_type<tc>, window_params = [{transform_indices = @transform_0, window_bounds = array<i64: 16, 768>}, {pipeline_mode = #tpu.pipeline_mode<synchronous>, transform_indices = @transform_1, window_bounds = array<i64: 768, 128>}, {pipeline_mode = #tpu.pipeline_mode<synchronous>, transform_indices = @transform_2, window_bounds = array<i64: 1, 128>}, {pipeline_mode = #tpu.pipeline_mode<synchronous>, transform_indices = @transform_3, window_bounds = array<i64: 128, 128>}, {pipeline_mode = #tpu.pipeline_mode<synchronous>, transform_indices = @transform_4, window_bounds = array<i64: 1, 128>}, {transform_indices = @transform_5, window_bounds = array<i64: 16, 128>}]} {
    %c0 = arith.constant 0 : index
    %c0_0 = arith.constant 0 : index
    %0 = vector.load %arg1[%c0, %c0_0] : memref<16x768xf32, #tpu.memory_space<vmem>>, vector<16x768xf32>
    %c0_1 = arith.constant 0 : index
    %c0_2 = arith.constant 0 : index
    %1 = vector.load %arg2[%c0_1, %c0_2] : memref<768x128xf32, #tpu.memory_space<vmem>>, vector<768x128xf32>
    %cst = arith.constant dense<0.000000e+00> : vector<16x128xf32>
    %2 = tpu.matmul %0, %1, %cst {dimension_numbers = #tpu.dot_dimension_numbers<[1], [0], [0], [1], [0, 0, 1, 1], [], []>} : vector<16x768xf32>, vector<768x128xf32>, vector<16x128xf32> -> vector<16x128xf32>
    %c0_3 = arith.constant 0 : index
    %c0_4 = arith.constant 0 : index
    %3 = vector.load %arg3[%c0_3, %c0_4] : memref<1x128xf32, #tpu.memory_space<vmem>>, vector<1x128xf32>
    %4 = vector.broadcast %3 : vector<1x128xf32> to vector<16x128xf32>
    %5 = arith.addf %2, %4 : vector<16x128xf32>
    %cst_5 = arith.constant dense<0.000000e+00> : vector<16xf32>
    %6 = vector.multi_reduction <add>, %5, %cst_5 [1] : vector<16x128xf32> to vector<16xf32>
    %7 = vector.shape_cast %6 : vector<16xf32> to vector<16x1xf32>
    %8 = arith.mulf %5, %5 : vector<16x128xf32>
    %cst_6 = arith.constant dense<0.000000e+00> : vector<16xf32>
    %9 = vector.multi_reduction <add>, %8, %cst_6 [1] : vector<16x128xf32> to vector<16xf32>
    %10 = vector.shape_cast %9 : vector<16xf32> to vector<16x1xf32>
    %cst_7 = arith.constant 5.000000e-02 : f32
    %11 = vector.broadcast %cst_7 : f32 to vector<16x1xf32>
    %12 = arith.mulf %7, %11 : vector<16x1xf32>
    %cst_8 = arith.constant 5.000000e-02 : f32
    %13 = vector.broadcast %cst_8 : f32 to vector<16x1xf32>
    %14 = arith.mulf %10, %13 : vector<16x1xf32>
    %15 = arith.mulf %12, %12 : vector<16x1xf32>
    %16 = arith.subf %14, %15 : vector<16x1xf32>
    %17 = vector.broadcast %12 : vector<16x1xf32> to vector<16x128xf32>
    %18 = arith.subf %5, %17 : vector<16x128xf32>
    %cst_9 = arith.constant 9.99999974E-6 : f32
    %19 = vector.broadcast %cst_9 : f32 to vector<16x1xf32>
    %20 = arith.addf %16, %19 : vector<16x1xf32>
    %21 = math.rsqrt %20 : vector<16x1xf32>
    %22 = vector.broadcast %21 : vector<16x1xf32> to vector<16x128xf32>
    %23 = arith.mulf %18, %22 : vector<16x128xf32>
    %cst_10 = arith.constant 0.000000e+00 : f32
    %24 = vector.broadcast %cst_10 : f32 to vector<16x128xf32>
    %25 = arith.maximumf %23, %24 : vector<16x128xf32>
    %c0_11 = arith.constant 0 : index
    %c0_12 = arith.constant 0 : index
    %26 = vector.load %arg4[%c0_11, %c0_12] : memref<128x128xf32, #tpu.memory_space<vmem>>, vector<128x128xf32>
    %cst_13 = arith.constant dense<0.000000e+00> : vector<16x128xf32>
    %27 = tpu.matmul %25, %26, %cst_13 {dimension_numbers = #tpu.dot_dimension_numbers<[1], [0], [0], [1], [0, 0, 1, 1], [], []>} : vector<16x128xf32>, vector<128x128xf32>, vector<16x128xf32> -> vector<16x128xf32>
    %c0_14 = arith.constant 0 : index
    %c0_15 = arith.constant 0 : index
    %28 = vector.load %arg5[%c0_14, %c0_15] : memref<1x128xf32, #tpu.memory_space<vmem>>, vector<1x128xf32>
    %29 = vector.broadcast %28 : vector<1x128xf32> to vector<16x128xf32>
    %30 = arith.addf %27, %29 : vector<16x128xf32>
    %c0_16 = arith.constant 0 : index
    %c0_17 = arith.constant 0 : index
    %31 = vector.load %arg6[%c0_16, %c0_17] : memref<16x128xf32, #tpu.memory_space<vmem>>, vector<16x128xf32>
    tpu.vector_store %arg6[%c0_16, %c0_17], %30 {strides = array<i32>} : memref<16x128xf32, #tpu.memory_space<vmem>>, vector<16x128xf32>,
    return
  }
  func.func @transform_0(%arg0: i32) -> (i32, i32) {
    %c0_i32 = arith.constant 0 : i32
    %c0_i32_0 = arith.constant 0 : i32
    return %arg0, %c0_i32 : i32, i32
  }
  func.func @transform_1(%arg0: i32) -> (i32, i32) {
    %c0_i32 = arith.constant 0 : i32
    %c0_i32_0 = arith.constant 0 : i32
    %c0_i32_1 = arith.constant 0 : i32
    return %c0_i32, %c0_i32_0 : i32, i32
  }
  func.func @transform_2(%arg0: i32) -> (i32, i32) {
    %c0_i32 = arith.constant 0 : i32
    %c0_i32_0 = arith.constant 0 : i32
    %c0_i32_1 = arith.constant 0 : i32
    return %c0_i32, %c0_i32_0 : i32, i32
  }
  func.func @transform_3(%arg0: i32) -> (i32, i32) {
    %c0_i32 = arith.constant 0 : i32
    %c0_i32_0 = arith.constant 0 : i32
    %c0_i32_1 = arith.constant 0 : i32
    return %c0_i32, %c0_i32_0 : i32, i32
  }
  func.func @transform_4(%arg0: i32) -> (i32, i32) {
    %c0_i32 = arith.constant 0 : i32
    %c0_i32_0 = arith.constant 0 : i32
    %c0_i32_1 = arith.constant 0 : i32
    return %c0_i32, %c0_i32_0 : i32, i32
  }
  func.func @transform_5(%arg0: i32) -> (i32, i32) {
    %c0_i32 = arith.constant 0 : i32
    %c0_i32_0 = arith.constant 0 : i32
    return %arg0, %c0_i32 : i32, i32
  }
}

</mosaic_0001>

<bundles_post_ra>
// kernel: tpu_custom_call.1
= control target key start
LH: loop header
LB: loop body
LE: loop exit
PB: predicated region body
PF: predicated region fallthrough
CT: control target
= control target key end

     0   :  { %10 = vsyncpa [#allocation3], 0  ;;  %s892_s0 = inlined_call_operand.hbm [shape: f32[16,768], index: 0, kind: input, shape index: {}]   ;;  %s893_s1 = inlined_call_operand.hbm [shape: f32[768,128], index: 1, kind: input, shape index: {}]   ;;  %s894_s2 = inlined_call_operand.vmem [shape: f32[1,128], index: 2, kind: input, shape index: {}]   ;;  %s895_s3 = inlined_call_operand.hbm [shape: f32[128,128], index: 3, kind: input, shape index: {}]   ;;  %s896_s4 = inlined_call_operand.vmem [shape: f32[1,128], index: 4, kind: input, shape index: {}]   ;;  %s897_s5 = inlined_call_operand.hbm [shape: f32[16,128], index: 5, kind: output, shape index: {}]  }
   0x1   :  { %11 = vsyncpa [#allocation6], 0 }
   0x2   :  { %12 = vsyncpa [#allocation4], 0  ;;  %s815_s18 = smov [#allocation5]  }
   0x3   :  { %s30_s19 = sshll.u32 %s815_s18, 4  ;;  %s31_s19 = int_to_ptr.vmem [resolvable:$true] %s30_s19 }
   0x4   :  { %s737_s20 = scalar_lea.vmem %s31_s19, 12288  ;;  %p742_p1 = scmp.lt.s32.totalorder %s31_s19, %s31_s19 }
   0x5   :  { %p738_p0 = scmp.ne.s32.totalorder %s31_s19, %s737_s20  ;;  %p743_p2 = scmp.lt.s32.totalorder %s737_s20, %s737_s20 }
   0x7   :  { %p744_p3 = por %p743_p2, %p742_p1 }
   0x9   :  { %p745_p4 = pnand %p744_p3, %p738_p0 }
   0xb   :  { %748 = shalt.err (!%p745_p4)
}
   0xc   :  { %s816_s21 = smov 128   ;;  %s817_s22 = smov 8  }
   0xd   :  { %36 = dma.hbm_to_vmem [thread:$0]  %s893_s1, 12288, %s31_s19, [#allocation6], %s816_s21, %s816_s21, %s817_s22  }
   0xe   :  { %s818_s25 = smov [#allocation2]  }
   0xf   :  { %s18_s26 = sshll.u32 %s818_s25, 4  ;;  %s19_s26 = int_to_ptr.vmem [resolvable:$true] %s18_s26 }
  0x10   :  { %s757_s27 = scalar_lea.vmem %s19_s26, 1536  ;;  %p762_p6 = scmp.lt.s32.totalorder %s19_s26, %s19_s26 }
  0x11   :  { %p758_p5 = scmp.ne.s32.totalorder %s19_s26, %s757_s27  ;;  %p763_p7 = scmp.lt.s32.totalorder %s757_s27, %s757_s27 }
  0x13   :  { %p764_p8 = por %p763_p7, %p762_p6 }
  0x15   :  { %p765_p9 = pnand %p764_p8, %p758_p5 }
  0x17   :  { %768 = shalt.err (!%p765_p9)
}
  0x18   :  { %s819_s28 = smov 768   ;;  %s820_s29 = smov 48  }
  0x19   :  { %24 = dma.hbm_to_vmem [thread:$0]  %s892_s0, 1536, %s19_s26, [#allocation3], %s819_s28, %s819_s28, %s820_s29  }
  0x1a   :  { %s821_s7 = smov [#allocation7]  }
  0x1b   :  { %s44_s8 = sshll.u32 %s821_s7, 4  ;;  %s45_s8 = int_to_ptr.vmem [resolvable:$true] %s44_s8 }
  0x1c   :  { %s777_s1 = scalar_lea.vmem %s45_s8, 2048  ;;  %p782_p11 = scmp.lt.s32.totalorder %s45_s8, %s45_s8 }
  0x1d   :  { %p778_p10 = scmp.ne.s32.totalorder %s45_s8, %s777_s1  ;;  %p783_p12 = scmp.lt.s32.totalorder %s777_s1, %s777_s1 }
  0x1f   :  { %p784_p13 = por %p783_p12, %p782_p11 }
  0x21   :  { %p785_p0 = pnand %p784_p13, %p778_p10 }
  0x23   :  { %788 = shalt.err (!%p785_p0)
}
  0x24   :  { %50 = dma.hbm_to_vmem [thread:$0]  %s895_s3, 2048, %s45_s8, [#allocation6], %s816_s21, %s816_s21, %s817_s22  }
  0x25   :  { %809 = dma.done.wait [#allocation3], 1536  }
  0x26   :  { %810 = vsyncadd [#allocation3], 4294965760 }
  0x27   :  { %811 = dma.done.wait [#allocation6], 14336  }
  0x28   :  { %812 = vsyncadd [#allocation6], 4294952960  ;;  %v105_v0 = vld [vmem:[#allocation5 + $0xf8] sm:$0xff]  ;;  %v104_v2 = vld [vmem:[#allocation5 + $0xf0] sm:$0xff]  ;;  %s822_s12 = smov [#allocation8]  }
  0x29   :  { %v89_v1 = vld [vmem:[#allocation5 + $0x78] sm:$0xff]  ;;  %550 = vmatprep.subr.mxu0 %v105_v0  ;;  %v88_v4 = vld [vmem:[#allocation5 + $0x70] sm:$0xff]  ;;  %v103_v6 = vld [vmem:[#allocation5 + $0xe8] sm:$0xff]  ;;  %s535_s13 = sshll.u32 %s822_s12, 4  ;;  %s536_s13 = int_to_ptr.vmem [resolvable:$true] %s535_s13 }
  0x2a   :  { %v137_v3 = vld [vmem:[#allocation5 + $0x1f8] sm:$0xff]  ;;  %551 = vmatpush3.msra.mxu0 %v89_v1  ;;  %v136_v7 = vld [vmem:[#allocation5 + $0x1f0] sm:$0xff]  ;;  %v87_v8 = vld [vmem:[#allocation5 + $0x68] sm:$0xff]  ;;  %s789_s14 = scalar_lea.vmem %s536_s13, 256  ;;  %p794_p2 = scmp.lt.s32.totalorder %s536_s13, %s536_s13 }
  0x2b   :  { %v121_v5 = vld [vmem:[#allocation5 + $0x178] sm:$0xff]  ;;  %588 = vmatprep.subr.mxu1 %v137_v3  ;;  %552 = vmatprep.subr.mxu0 %v104_v2  ;;  %v120_v9 = vld [vmem:[#allocation5 + $0x170] sm:$0xff]  ;;  %v135_v10 = vld [vmem:[#allocation5 + $0x1e8] sm:$0xff]  ;;  %p790_p1 = scmp.ne.s32.totalorder %s536_s13, %s789_s14  ;;  %p795_p3 = scmp.lt.s32.totalorder %s789_s14, %s789_s14 }
  0x2c   :  { %589 = vmatpush3.msra.mxu1 %v121_v5  ;;  %553 = vmatpush3.msra.mxu0 %v88_v4  ;;  %v102_v11 = vld [vmem:[#allocation5 + $0xe0] sm:$0xff]  ;;  %v119_v12 = vld [vmem:[#allocation5 + $0x168] sm:$0xff]  ;;  %v101_v15 = vld [vmem:[#allocation5 + $0xd8] sm:$0xff] }
  0x2d   :  { %590 = vmatprep.subr.mxu1 %v136_v7  ;;  %554 = vmatprep.subr.mxu0 %v103_v6  ;;  %v86_v13 = vld [vmem:[#allocation5 + $0x60] sm:$0xff]  ;;  %v85_v17 = vld [vmem:[#allocation5 + $0x58] sm:$0xff]  ;;  %v100_v19 = vld [vmem:[#allocation5 + $0xd0] sm:$0xff]  ;;  %p796_p4 = por %p795_p3, %p794_p2 }
  0x2e   :  { %591 = vmatpush3.msra.mxu1 %v120_v9  ;;  %v134_v14 = vld [vmem:[#allocation5 + $0x1e0] sm:$0xff]  ;;  %555 = vmatpush3.msra.mxu0 %v87_v8  ;;  %v133_v18 = vld [vmem:[#allocation5 + $0x1d8] sm:$0xff]  ;;  %v84_v21 = vld [vmem:[#allocation5 + $0x50] sm:$0xff] }
  0x2f   :  { %592 = vmatprep.subr.mxu1 %v135_v10  ;;  %v118_v16 = vld [vmem:[#allocation5 + $0x160] sm:$0xff]  ;;  %556 = vmatprep.subr.mxu0 %v102_v11  ;;  %v117_v20 = vld [vmem:[#allocation5 + $0x158] sm:$0xff]  ;;  %v132_v22 = vld [vmem:[#allocation5 + $0x1d0] sm:$0xff]  ;;  %p797_p5 = pnand %p796_p4, %p790_p1 }
  0x30   :  { %593 = vmatpush3.msra.mxu1 %v119_v12  ;;  %557 = vmatpush3.msra.mxu0 %v86_v13  ;;  %v99_v23 = vld [vmem:[#allocation5 + $0xc8] sm:$0xff]  ;;  %v116_v24 = vld [vmem:[#allocation5 + $0x150] sm:$0xff]  ;;  %v98_v27 = vld [vmem:[#allocation5 + $0xc0] sm:$0xff] }
  0x31   :  { %594 = vmatprep.subr.mxu1 %v134_v14  ;;  %558 = vmatprep.subr.mxu0 %v101_v15  ;;  %v83_v25 = vld [vmem:[#allocation5 + $0x48] sm:$0xff]  ;;  %v82_v29 = vld [vmem:[#allocation5 + $0x40] sm:$0xff]  ;;  %v97_v31 = vld [vmem:[#allocation5 + $0xb8] sm:$0xff] }
  0x32   :  { %595 = vmatpush3.msra.mxu1 %v118_v16  ;;  %559 = vmatpush3.msra.mxu0 %v85_v17  ;;  %v131_v26 = vld [vmem:[#allocation5 + $0x1c8] sm:$0xff]  ;;  %v130_v30 = vld [vmem:[#allocation5 + $0x1c0] sm:$0xff]  ;;  %v81_v33 = vld [vmem:[#allocation5 + $0x38] sm:$0xff] }
  0x33   :  { %596 = vmatprep.subr.mxu1 %v133_v18  ;;  %560 = vmatprep.subr.mxu0 %v100_v19  ;;  %v115_v28 = vld [vmem:[#allocation5 + $0x148] sm:$0xff]  ;;  %v114_v32 = vld [vmem:[#allocation5 + $0x140] sm:$0xff]  ;;  %v129_v34 = vld [vmem:[#allocation5 + $0x1b8] sm:$0xff] }
  0x34   :  { %597 = vmatpush3.msra.mxu1 %v117_v20  ;;  %561 = vmatpush3.msra.mxu0 %v84_v21  ;;  %v96_v35 = vld [vmem:[#allocation5 + $0xb0] sm:$0xff]  ;;  %v113_v36 = vld [vmem:[#allocation5 + $0x138] sm:$0xff]  ;;  %v95_v39 = vld [vmem:[#allocation5 + $0xa8] sm:$0xff] }
  0x35   :  { %598 = vmatprep.subr.mxu1 %v132_v22  ;;  %562 = vmatprep.subr.mxu0 %v99_v23  ;;  %v80_v37 = vld [vmem:[#allocation5 + $0x30] sm:$0xff]  ;;  %v79_v41 = vld [vmem:[#allocation5 + $0x28] sm:$0xff]  ;;  %v94_v43 = vld [vmem:[#allocation5 + $0xa0] sm:$0xff] }
  0x36   :  { %599 = vmatpush3.msra.mxu1 %v116_v24  ;;  %563 = vmatpush3.msra.mxu0 %v83_v25  ;;  %v128_v38 = vld [vmem:[#allocation5 + $0x1b0] sm:$0xff]  ;;  %v127_v42 = vld [vmem:[#allocation5 + $0x1a8] sm:$0xff]  ;;  %v78_v45 = vld [vmem:[#allocation5 + $0x20] sm:$0xff] }
  0x37   :  { %600 = vmatprep.subr.mxu1 %v131_v26  ;;  %564 = vmatprep.subr.mxu0 %v98_v27  ;;  %v112_v40 = vld [vmem:[#allocation5 + $0x130] sm:$0xff]  ;;  %v111_v44 = vld [vmem:[#allocation5 + $0x128] sm:$0xff]  ;;  %v126_v46 = vld [vmem:[#allocation5 + $0x1a0] sm:$0xff] }
  0x38   :  { %601 = vmatpush3.msra.mxu1 %v115_v28  ;;  %565 = vmatpush3.msra.mxu0 %v82_v29  ;;  %v93_v47 = vld [vmem:[#allocation5 + $0x98] sm:$0xff]  ;;  %v110_v48 = vld [vmem:[#allocation5 + $0x120] sm:$0xff]  ;;  %v92_v51 = vld [vmem:[#allocation5 + $0x90] sm:$0xff] }
  0x39   :  { %602 = vmatprep.subr.mxu1 %v130_v30  ;;  %566 = vmatprep.subr.mxu0 %v97_v31  ;;  %v77_v49 = vld [vmem:[#allocation5 + $0x18] sm:$0xff]  ;;  %v76_v53 = vld [vmem:[#allocation5 + $0x10] sm:$0xff]  ;;  %v91_v55 = vld [vmem:[#allocation5 + $0x88] sm:$0xff] }
  0x3a   :  { %603 = vmatpush3.msra.mxu1 %v114_v32  ;;  %567 = vmatpush3.msra.mxu0 %v81_v33  ;;  %v125_v50 = vld [vmem:[#allocation5 + $0x198] sm:$0xff]  ;;  %v124_v54 = vld [vmem:[#allocation5 + $0x190] sm:$0xff]  ;;  %v75_v57 = vld [vmem:[#allocation5 + $0x8] sm:$0xff] }
  0x3b   :  { %604 = vmatprep.subr.mxu1 %v129_v34  ;;  %568 = vmatprep.subr.mxu0 %v96_v35  ;;  %v109_v52 = vld [vmem:[#allocation5 + $0x118] sm:$0xff]  ;;  %v108_v56 = vld [vmem:[#allocation5 + $0x110] sm:$0xff]  ;;  %v123_v58 = vld [vmem:[#allocation5 + $0x188] sm:$0xff] }
  0x3c   :  { %605 = vmatpush3.msra.mxu1 %v113_v36  ;;  %569 = vmatpush3.msra.mxu0 %v80_v37  ;;  %v90_v59 = vld [vmem:[#allocation5 + $0x80] sm:$0xff]  ;;  %v63_v60 = vld [vmem:[#allocation2 + $0x8] sm:$0xff]  ;;  %v169_v1 = vld [vmem:[#allocation5 + $0x2f8] sm:$0xff] }
  0x3d   :  { %606 = vmatprep.subr.mxu1 %v128_v38  ;;  %570 = vmatprep.subr.mxu0 %v95_v39  ;;  %v74_v61 = vld [vmem:[#allocation5] sm:$0xff]  ;;  %v107_v62 = vld [vmem:[#allocation5 + $0x108] sm:$0xff]  ;;  %v65_v3 = vld [vmem:[#allocation2 + $0x18] sm:$0xff] }
  0x3e   :  { %607 = vmatpush3.msra.mxu1 %v112_v40  ;;  %571 = vmatpush3.msra.mxu0 %v79_v41  ;;  %v62_v63 = vld [vmem:[#allocation2] sm:$0xff]  ;;  %v153_v4 = vld [vmem:[#allocation5 + $0x278] sm:$0xff]  ;;  %v64_v5 = vld [vmem:[#allocation2 + $0x10] sm:$0xff] }
  0x3f   :  { %608 = vmatprep.subr.mxu1 %v127_v42  ;;  %572 = vmatprep.subr.mxu0 %v94_v43  ;;  %v122_v0 = vld [vmem:[#allocation5 + $0x180] sm:$0xff]  ;;  %v168_v6 = vld [vmem:[#allocation5 + $0x2f0] sm:$0xff]  ;;  %v69_v8 = vld [vmem:[#allocation2 + $0x38] sm:$0xff] }
  0x40   :  { %609 = vmatpush3.msra.mxu1 %v111_v44  ;;  %573 = vmatpush3.msra.mxu0 %v78_v45  ;;  %v106_v2 = vld [vmem:[#allocation5 + $0x100] sm:$0xff]  ;;  %v152_v7 = vld [vmem:[#allocation5 + $0x270] sm:$0xff]  ;;  %v167_v9 = vld [vmem:[#allocation5 + $0x2e8] sm:$0xff] }
  0x41   :  { %610 = vmatprep.subr.mxu1 %v126_v46  ;;  %574 = vmatprep.subr.mxu0 %v93_v47  ;;  %v68_v10 = vld [vmem:[#allocation2 + $0x30] sm:$0xff]  ;;  %v151_v11 = vld [vmem:[#allocation5 + $0x268] sm:$0xff]  ;;  %v166_v13 = vld [vmem:[#allocation5 + $0x2e0] sm:$0xff] }
  0x42   :  { %611 = vmatpush3.msra.mxu1 %v110_v48  ;;  %575 = vmatpush3.msra.mxu0 %v77_v49  ;;  %v71_v12 = vld [vmem:[#allocation2 + $0x48] sm:$0xff]  ;;  %v70_v14 = vld [vmem:[#allocation2 + $0x40] sm:$0xff]  ;;  %v165_v17 = vld [vmem:[#allocation5 + $0x2d8] sm:$0xff] }
  0x43   :  { %612 = vmatprep.subr.mxu1 %v125_v50  ;;  %576 = vmatprep.subr.mxu0 %v92_v51  ;;  %v150_v15 = vld [vmem:[#allocation5 + $0x260] sm:$0xff]  ;;  %v67_v16 = vld [vmem:[#allocation2 + $0x28] sm:$0xff]  ;;  %v149_v18 = vld [vmem:[#allocation5 + $0x258] sm:$0xff] }
  0x44   :  { %613 = vmatpush3.msra.mxu1 %v109_v52  ;;  %577 = vmatpush3.msra.mxu0 %v76_v53  ;;  %v164_v19 = vld [vmem:[#allocation5 + $0x2d0] sm:$0xff]  ;;  %v163_v21 = vld [vmem:[#allocation5 + $0x2c8] sm:$0xff]  ;;  %v162_v23 = vld [vmem:[#allocation5 + $0x2c0] sm:$0xff] }
  0x45   :  { %614 = vmatprep.subr.mxu1 %v124_v54  ;;  %578 = vmatprep.subr.mxu0 %v91_v55  ;;  %v148_v20 = vld [vmem:[#allocation5 + $0x250] sm:$0xff]  ;;  %v147_v22 = vld [vmem:[#allocation5 + $0x248] sm:$0xff]  ;;  %v146_v24 = vld [vmem:[#allocation5 + $0x240] sm:$0xff] }
  0x46   :  { %615 = vmatpush3.msra.mxu1 %v108_v56  ;;  %579 = vmatpush3.msra.mxu0 %v75_v57  ;;  %v161_v25 = vld [vmem:[#allocation5 + $0x2b8] sm:$0xff]  ;;  %v160_v27 = vld [vmem:[#allocation5 + $0x2b0] sm:$0xff]  ;;  %v159_v29 = vld [vmem:[#allocation5 + $0x2a8] sm:$0xff] }
  0x47   :  { %616 = vmatprep.subr.mxu1 %v123_v58  ;;  %580 = vmatprep.subr.mxu0 %v90_v59  ;;  %v145_v26 = vld [vmem:[#allocation5 + $0x238] sm:$0xff]  ;;  %v144_v28 = vld [vmem:[#allocation5 + $0x230] sm:$0xff]  ;;  %v143_v30 = vld [vmem:[#allocation5 + $0x228] sm:$0xff] }
  0x48   :  { %241 = vmatprep.mubr.f32.mxu0 %v63_v60  ;;  %581 = vmatpush3.msra.mxu0 %v74_v61  ;;  %v158_v31 = vld [vmem:[#allocation5 + $0x2a0] sm:$0xff]  ;;  %v157_v33 = vld [vmem:[#allocation5 + $0x298] sm:$0xff]  ;;  %v156_v35 = vld [vmem:[#allocation5 + $0x290] sm:$0xff] }
  0x49   :  { %617 = vmatpush3.msra.mxu1 %v107_v62  ;;  %242 = vmatmul.mubr.f32.vlgmr.msra.gmra.mxu0 %v62_v63  ;;  %v142_v32 = vld [vmem:[#allocation5 + $0x220] sm:$0xff]  ;;  %v141_v34 = vld [vmem:[#allocation5 + $0x218] sm:$0xff]  ;;  %v140_v36 = vld [vmem:[#allocation5 + $0x210] sm:$0xff] }
  0x4a   :  { %618 = vmatprep.subr.mxu1 %v122_v0  ;;  %626 = vmatprep.subr.mxu0 %v169_v1  ;;  %v155_v37 = vld [vmem:[#allocation5 + $0x288] sm:$0xff]  ;;  %v154_v39 = vld [vmem:[#allocation5 + $0x280] sm:$0xff]  ;;  %v73_v42 = vld [vmem:[#allocation2 + $0x58] sm:$0xff] }
  0x4b   :  { %619 = vmatpush3.msra.mxu1 %v106_v2  ;;  %316 = vmatprep.mubr.f32.mxu1 %v65_v3  ;;  %v139_v38 = vld [vmem:[#allocation5 + $0x208] sm:$0xff]  ;;  %v138_v40 = vld [vmem:[#allocation5 + $0x200] sm:$0xff]  ;;  %v72_v43 = vld [vmem:[#allocation2 + $0x50] sm:$0xff] }
  0x4c   :  { %627 = vmatpush3.msra.mxu0 %v153_v4  ;;  %317 = vmatmul.mubr.f32.vlgmr.msra.gmra.mxu1 %v64_v5  ;;  %v66_v41 = vld [vmem:[#allocation2 + $0x20] sm:$0xff]  ;;  %v445_v44 = vld [vmem:[#allocation7 + $0x78] sm:$0xff] }
  0x4d   :  { %628 = vmatprep.subr.mxu0 %v168_v6  ;;  %246 = vmatprep.mubr.f32.mxu0 %v69_v8  ;;  %v548_v51 = vld [vmem:[%s894_s2] ss:$0 sm:$0xff]  ;;  %v444_v8 = vld [vmem:[#allocation7 + $0x70] sm:$0xff] }
  0x4e   :  { %629 = vmatpush3.msra.mxu0 %v152_v7  ;;  %321 = vmatprep.mubr.f32.mxu1 %v71_v12  ;;  %v440_v12 = vld [vmem:[#allocation7 + $0x50] sm:$0xff] }
  0x4f   :  { %630 = vmatprep.subr.mxu0 %v167_v9  ;;  %247 = vmatmul.mubr.f32.gmra.mxu0 %v68_v10  ;;  %v443_v9 = vld [vmem:[#allocation7 + $0x68] sm:$0xff]  ;;  %v442_v10 = vld [vmem:[#allocation7 + $0x60] sm:$0xff] }
  0x50   :  { %631 = vmatpush3.msra.mxu0 %v151_v11  ;;  %322 = vmatmul.mubr.f32.gmra.mxu1 %v70_v14  ;;  %v441_v11 = vld [vmem:[#allocation7 + $0x58] sm:$0xff]  ;;  %v438_v14 = vld [vmem:[#allocation7 + $0x40] sm:$0xff] }
  0x51   :  { %632 = vmatprep.subr.mxu0 %v166_v13  ;;  %391 = vmatprep.mubr.f32.mxu0 %v67_v16  ;;  %v439_v13 = vld [vmem:[#allocation7 + $0x48] sm:$0xff]  ;;  %v436_v16 = vld [vmem:[#allocation7 + $0x30] sm:$0xff] }
  0x52   :  { %633 = vmatpush3.msra.mxu0 %v150_v15  ;;  %682 = vmatprep.subr.mxu1 %v445_v44  ;;  %v437_v15 = vld [vmem:[#allocation7 + $0x38] sm:$0xff] }
  0x53   :  { %634 = vmatprep.subr.mxu0 %v165_v17  ;;  %683 = vmatpush3.msra.mxu1 %v445_v44  ;;  %v435_v17 = vld [vmem:[#allocation7 + $0x28] sm:$0xff] }
  0x54   :  { %635 = vmatpush3.msra.mxu0 %v149_v18  ;;  %684 = vmatprep.subr.mxu1 %v444_v8  ;;  %v434_v18 = vld [vmem:[#allocation7 + $0x20] sm:$0xff] }
  0x55   :  { %636 = vmatprep.subr.mxu0 %v164_v19  ;;  %685 = vmatpush3.msra.mxu1 %v444_v8  ;;  %v433_v19 = vld [vmem:[#allocation7 + $0x18] sm:$0xff] }
  0x56   :  { %637 = vmatpush3.msra.mxu0 %v148_v20  ;;  %686 = vmatprep.subr.mxu1 %v443_v9  ;;  %v432_v20 = vld [vmem:[#allocation7 + $0x10] sm:$0xff] }
  0x57   :  { %638 = vmatprep.subr.mxu0 %v163_v21  ;;  %687 = vmatpush3.msra.mxu1 %v443_v9  ;;  %v431_v21 = vld [vmem:[#allocation7 + $0x8] sm:$0xff] }
  0x58   :  { %639 = vmatpush3.msra.mxu0 %v147_v22  ;;  %688 = vmatprep.subr.mxu1 %v442_v10  ;;  %v430_v22 = vld [vmem:[#allocation7] sm:$0xff] }
  0x59   :  { %640 = vmatprep.subr.mxu0 %v162_v23  ;;  %689 = vmatpush3.msra.mxu1 %v442_v10 }
  0x5a   :  { %641 = vmatpush3.msra.mxu0 %v146_v24  ;;  %690 = vmatprep.subr.mxu1 %v441_v11 }
  0x5b   :  { %642 = vmatprep.subr.mxu0 %v161_v25  ;;  %691 = vmatpush3.msra.mxu1 %v441_v11 }
  0x5c   :  { %643 = vmatpush3.msra.mxu0 %v145_v26  ;;  %692 = vmatprep.subr.mxu1 %v440_v12 }
  0x5d   :  { %644 = vmatprep.subr.mxu0 %v160_v27  ;;  %693 = vmatpush3.msra.mxu1 %v440_v12 }
  0x5e   :  { %645 = vmatpush3.msra.mxu0 %v144_v28  ;;  %694 = vmatprep.subr.mxu1 %v439_v13 }
  0x5f   :  { %646 = vmatprep.subr.mxu0 %v159_v29  ;;  %695 = vmatpush3.msra.mxu1 %v439_v13 }
  0x60   :  { %647 = vmatpush3.msra.mxu0 %v143_v30  ;;  %696 = vmatprep.subr.mxu1 %v438_v14 }
  0x61   :  { %648 = vmatprep.subr.mxu0 %v158_v31  ;;  %697 = vmatpush3.msra.mxu1 %v438_v14 }
  0x62   :  { %649 = vmatpush3.msra.mxu0 %v142_v32  ;;  %698 = vmatprep.subr.mxu1 %v437_v15 }
  0x63   :  { %650 = vmatprep.subr.mxu0 %v157_v33  ;;  %699 = vmatpush3.msra.mxu1 %v437_v15 }
  0x64   :  { %651 = vmatpush3.msra.mxu0 %v141_v34  ;;  %700 = vmatprep.subr.mxu1 %v436_v16 }
  0x65   :  { %652 = vmatprep.subr.mxu0 %v156_v35  ;;  %701 = vmatpush3.msra.mxu1 %v436_v16 }
  0x66   :  { %653 = vmatpush3.msra.mxu0 %v140_v36  ;;  %702 = vmatprep.subr.mxu1 %v435_v17 }
  0x67   :  { %654 = vmatprep.subr.mxu0 %v155_v37  ;;  %703 = vmatpush3.msra.mxu1 %v435_v17 }
  0x68   :  { %655 = vmatpush3.msra.mxu0 %v139_v38  ;;  %704 = vmatprep.subr.mxu1 %v434_v18 }
  0x69   :  { %656 = vmatprep.subr.mxu0 %v154_v39  ;;  %705 = vmatpush3.msra.mxu1 %v434_v18 }
  0x6a   :  { %657 = vmatpush3.msra.mxu0 %v138_v40  ;;  %706 = vmatprep.subr.mxu1 %v433_v19 }
  0x6b   :  { %392 = vmatmul.mubr.f32.vlgmr.msra.gmra.mxu0 %v66_v41  ;;  %707 = vmatpush3.msra.mxu1 %v433_v19 }
  0x6c   :  { %396 = vmatprep.mubr.f32.mxu0 %v73_v42  ;;  %708 = vmatprep.subr.mxu1 %v432_v20 }
  0x6d   :  { %709 = vmatpush3.msra.mxu1 %v432_v20 }
  0x6e   :  { %710 = vmatprep.subr.mxu1 %v431_v21 }
  0x6f   :  { %397 = vmatmul.mubr.f32.gmra.mxu0 %v72_v43  ;;  %711 = vmatpush3.msra.mxu1 %v431_v21 }
  0x70   :  { %712 = vmatprep.subr.mxu1 %v430_v22 }
  0x71   :  { %713 = vmatpush3.msra.mxu1 %v430_v22 }
 0x109   :  { %v582_v45 = vpop.f32.mrf.mxu0 }
 0x10b   :  { %v583_v46 = vpop.f32.mrf.mxu0 }
 0x10c   :  { %v620_v47 = vpop.f32.mrf.mxu1  ;;  %v584_v50 = vadd.f32 %v583_v46, %v582_v45  ;;  %v549_v45 = vld [vmem:[%s896_s4] ss:$0 sm:$0xff] }
 0x10e   :  { %v621_v49 = vpop.f32.mrf.mxu1  ;;  %v244_v54 = vadd.f32 %v584_v50, %v548_v51 }
 0x10f   :  { %v585_v48 = vpop.f32.mrf.mxu0  ;;  %v622_v55 = vadd.f32 %v621_v49, %v620_v47 }
 0x110   :  { %v623_v53 = vpop.f32.mrf.mxu1 }
 0x111   :  { %v586_v52 = vpop.f32.mrf.mxu0  ;;  %v319_v60 = vadd.f32 %v622_v55, %v244_v54 }
 0x112   :  { %v587_v56 = vadd.f32 %v586_v52, %v585_v48  ;;  %v624_v57 = vpop.f32.mrf.mxu1 }
 0x113   :  { %v625_v62 = vadd.f32 %v624_v57, %v623_v53 }
 0x114   :  { %v249_v61 = vadd.f32 %v587_v56, %v548_v51 }
 0x116   :  { %v324_v3 = vadd.f32 %v625_v62, %v249_v61 }
 0x12b   :  { %v658_v58 = vpop.f32.mrf.mxu0 }
 0x12d   :  { %v659_v59 = vpop.f32.mrf.mxu0 }
 0x12e   :  { %v660_v63 = vadd.f32 %v659_v59, %v658_v58 }
 0x12f   :  { %v661_v0 = vpop.f32.mrf.mxu0 }
 0x130   :  { %v871_v1 = vadd.f32 %v660_v63, %v319_v60 }
 0x131   :  { %v662_v2 = vpop.f32.mrf.mxu0 }
 0x132   :  { %v663_v4 = vadd.f32 %v662_v2, %v661_v0  ;;  %402 = vadd.xlane.f32.xlu0 %v871_v1  ;;  %v406_v5 = vmul.f32 %v871_v1, %v871_v1 }
 0x134   :  { %v876_v6 = vadd.f32 %v663_v4, %v324_v3  ;;  %408 = vadd.xlane.f32.xlu1 %v406_v5 }
 0x136   :  { %404 = vadd.xlane.f32.xlu0 %v876_v6  ;;  %v407_v7 = vmul.f32 %v876_v6, %v876_v6 }
 0x138   :  { %410 = vadd.xlane.f32.xlu1 %v407_v7 }
 0x1bb   :  { %v403_v23 = vpop.xlane.xlu0 %402 }
 0x1bc   :  { %v412_v24 = vmul.f32 0.05, %v403_v23 }
 0x1bd   :  { %v409_v25 = vpop.xlane.xlu1 %408 }
 0x1be   :  { %v416_v26 = vmul.f32 %v412_v24, %v412_v24  ;;  %v414_v27 = vmul.f32 0.05, %v409_v25  ;;  %v420_v37 = vsub.f32 %v871_v1, %v412_v24 }
 0x1bf   :  { %v405_v28 = vpop.xlane.xlu0 %404 }
 0x1c0   :  { %v418_v29 = vsub.f32 %v414_v27, %v416_v26  ;;  %v413_v30 = vmul.f32 0.05, %v405_v28 }
 0x1c1   :  { %v411_v31 = vpop.xlane.xlu1 %410 }
 0x1c2   :  { %v422_v32 = vadd.f32 1e-05, %v418_v29  ;;  %v417_v33 = vmul.f32 %v413_v30, %v413_v30  ;;  %v415_v34 = vmul.f32 0.05, %v411_v31  ;;  %v421_v40 = vsub.f32 %v876_v6, %v413_v30 }
 0x1c4   :  { %725 = vrsqrt.f32 %v422_v32  ;;  %v419_v35 = vsub.f32 %v415_v34, %v417_v33 }
 0x1c6   :  { %v423_v36 = vadd.f32 1e-05, %v419_v35 }
 0x1c8   :  { %727 = vrsqrt.f32 %v423_v36 }
 0x1d1   :  { %v726_v38 = vpop.eup %725 }
 0x1d2   :  { %v426_v39 = vmul.f32 %v726_v38, %v420_v37 }
 0x1d4   :  { %v428_v41 = vmax.f32 %v426_v39, 0.0 }
 0x1d5   :  { %v728_v42 = vpop.eup %727 }
 0x1d6   :  { %714 = vmatprep.mubr.f32.mxu1 %v428_v41  ;;  %v427_v43 = vmul.f32 %v728_v42, %v421_v40 }
 0x1d8   :  { %v429_v44 = vmax.f32 %v427_v43, 0.0 }
 0x1da   :  { %715 = vmatmul.mubr.f32.vlgmr.msra.gmra.mxu1 %v429_v44 }
 0x29a   :  { %v716_v46 = vpop.f32.mrf.mxu1 }
 0x29b   :  { %v525_v47 = vadd.f32 %v716_v46, %v549_v45 }
 0x29c   :  { %v519_v48 = vpop.f32.mrf.mxu1 }
 0x29d   :  { %529 = vst [vmem:[#allocation8 + $0x8] sm:$0xff] %v525_v47  ;;  %v520_v49 = vadd.f32 %v549_v45, %v519_v48 }
 0x29f   :  { %528 = vst [vmem:[#allocation8] sm:$0xff] %v520_v49 }
 0x2a0   :  { %800 = shalt.err (!%p797_p5)
}
 0x2a1   :  { %541 = dma.vmem_to_hbm [thread:$0]  %s536_s13, 256, %s897_s5, [#allocation4], %s816_s21, %s816_s21, %s817_s22  }
 0x2a2   :  { %813 = dma.done.wait [#allocation4], 256  }
 0x2a3   :  { %814 = vsyncadd [#allocation4], 4294967040 }
 0x2a4   :  { %545 = vsyncpa [#allocation3], 1 }
 0x2a5   :  { %546 = vsyncpa [#allocation6], 1 }
 0x2a6   :  { %547 = vsyncpa [#allocation4], 1 }

</bundles_post_ra>
